<compile_context>
chip_gen: v6e
topology: v6e:2x2x1
jax: 0.10.0
libtpu: 0.0.40
codegen_flags: <defaults>
</compile_context>

<pallas_src>
import functools

import jax
import jax.numpy as jnp
from jax.experimental import pallas as pl
from jax.experimental.pallas import tpu as pltpu

LANE = 128
SUBLANE = 8
_FMA_K_THRESHOLD = 8   # use VPU FMAs instead of an MXU pass when K is this small


def _round_up(n, m):
    return ((n + m - 1) // m) * m


def _cdiv(a, b):
    return (a + b - 1) // b


def _vmem_capacity_bytes():
    try:
        return int(pltpu.get_tpu_info().vmem_capacity_bytes)
    except Exception:
        return 64 * 1024 * 1024   # conservative default: v7x per-TensorCore VMEM


def _mlp_kernel(num_layers, first_layer_fma, carry_dtype, *refs):
    """refs = (x_ref, w0, b0, ..., w_{L-1}, b_{L-1}, out_ref).

    Hidden layers: Linear + ReLU; final layer: Linear only (matches the PyTorch
    nn.Sequential).  Weights arrive pre-transposed to (in, out) and zero-padded
    to lane-dense (multiple-of-128) widths, so every intermediate activation is
    lane-dense; only the single final store to the (tb, action_size) output
    block is lane-masked.
    """
    x_ref = refs[0]
    out_ref = refs[-1]
    params = refs[1:-1]

    h = x_ref[...].astype(jnp.float32)                      # (tb, state_size)
    for li in range(num_layers):
        w_ref = params[2 * li]
        b = params[2 * li + 1][...].astype(jnp.float32)     # (1, out_pad)
        if li == 0 and first_layer_fma:
            # K == state_size is tiny: a K=2 MXU pass is ~pure pipeline latency,
            # so do statically-unrolled broadcasted VPU FMAs instead.
            w = w_ref[...].astype(jnp.float32)              # (K, out_pad)
            acc = b                                         # broadcasts to (tb, out_pad)
            for k in range(w.shape[0]):
                acc = acc + h[:, k:k + 1] * w[k:k + 1, :]
            h = acc
        else:
            w = w_ref[...]
            h = jnp.dot(h.astype(w.dtype), w,
                        preferred_element_type=jnp.float32) + b
        if li < num_layers - 1:
            # ReLU; carry bf16 between hidden layers on the bf16 path (halves
            # activation footprint / spill traffic; MXU accumulation stays f32).
            h = jnp.maximum(h, 0.0).astype(carry_dtype)

    a = out_ref.shape[-1]                                   # action_size (unpadded)
    out_ref[...] = h[:, :a].astype(out_ref.dtype)


def prepare_params(weights, biases, *, matmul_dtype=jnp.float32):
    """Pad/cast parameters ONCE (outside the per-step hot path).

    weights: list of (in, out) float32 arrays (already torch_weight.T)
    biases:  list of (out,)   float32 arrays
    """
    num_layers = len(weights)
    state_size = weights[0].shape[0]
    action_size = weights[-1].shape[1]
    out_dims = [w.shape[1] for w in weights]
    out_pads = [_round_up(d, LANE) for d in out_dims]
    in_pads = [state_size] + out_pads[:-1]
    first_layer_fma = state_size <= _FMA_K_THRESHOLD

    padded_w, padded_b = [], []
    for li, (w, b) in enumerate(zip(weights, biases)):
        wp = jnp.zeros((in_pads[li], out_pads[li]), jnp.float32)
        wp = wp.at[:w.shape[0], :w.shape[1]].set(w.astype(jnp.float32))
        bp = jnp.zeros((1, out_pads[li]), jnp.float32)
        bp = bp.at[0, :b.shape[0]].set(b.astype(jnp.float32))
        if matmul_dtype != jnp.float32 and not (li == 0 and first_layer_fma):
            wp = wp.astype(matmul_dtype)   # dot operands only; v5e keeps f32
        padded_w.append(wp)
        padded_b.append(bp)

    return dict(
        weights=padded_w, biases=padded_b,
        num_layers=num_layers, state_size=state_size, action_size=action_size,
        in_pads=in_pads, out_pads=out_pads,
        first_layer_fma=first_layer_fma,
        carry_dtype=(matmul_dtype if matmul_dtype != jnp.float32 else jnp.float32),
    )


def dqn_forward(x, params, *, block_b=1024, min_batch_tiles=2):
    """DQN MLP forward pass in one Pallas kernel (hot path).

    x: (B, state_size) float32;  params: output of prepare_params().
    """
    num_layers = params["num_layers"]
    state_size = params["state_size"]
    action_size = params["action_size"]
    in_pads, out_pads = params["in_pads"], params["out_pads"]

    B = x.shape[0]
    assert x.shape[1] == state_size

    # ---- batch tiling: pipelined x/out DMA; >=2 tiles when B allows so both
    #      v7x TensorCores get work (axis marked "parallel"). ----
    tb_cap = _round_up(min(block_b, max(B, SUBLANE)), SUBLANE)
    n_tiles = _cdiv(_round_up(B, SUBLANE), tb_cap)
    if n_tiles < min_batch_tiles and B >= min_batch_tiles * SUBLANE:
        n_tiles = min_batch_tiles
    tb = _round_up(_cdiv(B, n_tiles), SUBLANE)
    b_pad = n_tiles * tb

    x_p = x.astype(jnp.float32)
    if b_pad != B:
        x_p = jnp.pad(x_p, ((0, b_pad - B), (0, 0)))

    operands = [x_p]
    for w, b in zip(params["weights"], params["biases"]):
        operands.append(w)
        operands.append(b)

    # ---- generation-aware VMEM budget (counts activations + resident params) ----
    def _nbytes(shape, dtype):
        n = 1
        for s in shape:
            n *= s
        return n * jnp.dtype(dtype).itemsize

    pipelined = 2 * (_nbytes((tb, state_size), jnp.float32)
                     + _nbytes((tb, action_size), jnp.float32))
    resident = 0
    for li in range(num_layers):
        resident += _nbytes((in_pads[li], out_pads[li]), params["weights"][li].dtype)
        resident += _nbytes((1, out_pads[li]), jnp.float32)
    acts = sum(_nbytes((tb, out_pads[li]), jnp.float32) for li in range(num_layers))
    needed = pipelined + 2 * resident + acts
    vmem_cap = _vmem_capacity_bytes()
    vmem_limit = int(min(max(2 * needed, 8 * 1024 * 1024), int(0.75 * vmem_cap)))

    kernel = functools.partial(_mlp_kernel, num_layers,
                               params["first_layer_fma"], params["carry_dtype"])
    grid = (b_pad // tb,)

    def _call(single_buffer_weights):
        in_specs = [pl.BlockSpec((tb, state_size), lambda i: (i, 0))]
        for li in range(num_layers):
            w_shape = (in_pads[li], out_pads[li])
            b_shape = (1, out_pads[li])
            if single_buffer_weights:
                # constant-index residents: no point double-buffering them
                in_specs.append(pl.BlockSpec(w_shape, lambda i: (0, 0),
                                             pipeline_mode=pl.Buffered(1)))
                in_specs.append(pl.BlockSpec(b_shape, lambda i: (0, 0),
                                             pipeline_mode=pl.Buffered(1)))
            else:
                in_specs.append(pl.BlockSpec(w_shape, lambda i: (0, 0)))
                in_specs.append(pl.BlockSpec(b_shape, lambda i: (0, 0)))
        # unpadded output block: last dim equals full array dim -> legal; the
        # only lane-masked store is this final one (HBM writeback is ~12 B/sample).
        out_spec = pl.BlockSpec((tb, action_size), lambda i: (i, 0))
        return pl.pallas_call(
            kernel,
            out_shape=jax.ShapeDtypeStruct((b_pad, action_size), jnp.float32),
            grid=grid,
            in_specs=in_specs,
            out_specs=out_spec,
            compiler_params=pltpu.CompilerParams(
                dimension_semantics=("parallel",),
                vmem_limit_bytes=vmem_limit,
            ),
        )(*operands)

    try:
        out_padded = _call(True)
    except Exception:
        # fallback if pipeline_mode / Buffered(1) is unsupported in this jax build
        out_padded = _call(False)

    return out_padded[:B]


def init_params(key, state_size, action_size, hidden_layer_sizes):
    """Deterministic init matching PyTorch nn.Linear default:
    U(-1/sqrt(fan_in), 1/sqrt(fan_in)) for both weight and bias."""
    sizes = [state_size] + list(hidden_layer_sizes) + [action_size]
    weights, biases = [], []
    for i in range(len(sizes) - 1):
        fan_in, fan_out = sizes[i], sizes[i + 1]
        key, kw, kb = jax.random.split(key, 3)
        bound = 1.0 / jnp.sqrt(jnp.asarray(fan_in, jnp.float32))
        # stored directly as (in, out) == torch_weight.T
        w = jax.random.uniform(kw, (fan_in, fan_out), jnp.float32, -bound, bound)
        b = jax.random.uniform(kb, (fan_out,), jnp.float32, -bound, bound)
        weights.append(w)
        biases.append(b)
    return weights, biases


def reference_forward(x, weights, biases):
    h = x
    n = len(weights)
    for i, (w, b) in enumerate(zip(weights, biases)):
        h = h @ w + b
        if i < n - 1:
            h = jnp.maximum(h, 0.0)
    return h


if __name__ == "__main__":
    # MountainCar-v0: state_size = 2, action_size = 3
    state_size = 2
    action_size = 3
    hidden_layer_sizes = (32, 32)

    key = jax.random.PRNGKey(0)
    key, kx = jax.random.split(key)
    batch = 8
    x = jax.random.normal(kx, (batch, state_size), jnp.float32)

    weights, biases = init_params(key, state_size, action_size, hidden_layer_sizes)
    params = prepare_params(weights, biases)       # pad/transpose ONCE (off hot path)

    out = jax.block_until_ready(dqn_forward(x, params))
    ref = reference_forward(x, weights, biases)
    assert out.shape == (batch, action_size)
    assert jnp.allclose(out, ref, atol=1e-5, rtol=1e-5), "mismatch vs reference (small batch)"

    # exercise the multi-tile + batch-padding path (grid > 1, B not tile-aligned)
    key, kx2 = jax.random.split(key)
    x2 = jax.random.normal(kx2, (260, state_size), jnp.float32)
    out2 = jax.block_until_ready(dqn_forward(x2, params, block_b=128))
    ref2 = reference_forward(x2, weights, biases)
    assert out2.shape == (260, action_size)
    assert jnp.allclose(out2, ref2, atol=1e-5, rtol=1e-5), "mismatch vs reference (tiled batch)"

    print("KERNEL_OK")
</pallas_src>

<mosaic_0001>
module attributes {stable_mosaic.version = 11 : i64} {
  func.func @_mlp_kernel(%arg0: i32, %arg1: memref<8x2xf32, #tpu.memory_space<vmem>>, %arg2: memref<2x128xf32, #tpu.memory_space<vmem>>, %arg3: memref<1x128xf32, #tpu.memory_space<vmem>>, %arg4: memref<128x128xf32, #tpu.memory_space<vmem>>, %arg5: memref<1x128xf32, #tpu.memory_space<vmem>>, %arg6: memref<128x128xf32, #tpu.memory_space<vmem>>, %arg7: memref<1x128xf32, #tpu.memory_space<vmem>>, %arg8: memref<8x3xf32, #tpu.memory_space<vmem>>) attributes {dimension_semantics = [#tpu.dimension_semantics<parallel>], iteration_bounds = array<i64: 1>, scalar_prefetch = 0 : i64, scratch_operands = 0 : i64, tpu.core_type = #tpu.core_type<tc>, window_params = [{transform_indices = @transform_0, window_bounds = array<i64: 8, 2>}, {pipeline_mode = #tpu.pipeline_mode<synchronous>, transform_indices = @transform_1, window_bounds = array<i64: 2, 128>}, {pipeline_mode = #tpu.pipeline_mode<synchronous>, transform_indices = @transform_2, window_bounds = array<i64: 1, 128>}, {pipeline_mode = #tpu.pipeline_mode<synchronous>, transform_indices = @transform_3, window_bounds = array<i64: 128, 128>}, {pipeline_mode = #tpu.pipeline_mode<synchronous>, transform_indices = @transform_4, window_bounds = array<i64: 1, 128>}, {pipeline_mode = #tpu.pipeline_mode<synchronous>, transform_indices = @transform_5, window_bounds = array<i64: 128, 128>}, {pipeline_mode = #tpu.pipeline_mode<synchronous>, transform_indices = @transform_6, window_bounds = array<i64: 1, 128>}, {transform_indices = @transform_7, window_bounds = array<i64: 8, 3>}]} {
    %c0 = arith.constant 0 : index
    %c0_0 = arith.constant 0 : index
    %0 = vector.load %arg1[%c0, %c0_0] : memref<8x2xf32, #tpu.memory_space<vmem>>, vector<8x2xf32>
    %c0_1 = arith.constant 0 : index
    %c0_2 = arith.constant 0 : index
    %1 = vector.load %arg3[%c0_1, %c0_2] : memref<1x128xf32, #tpu.memory_space<vmem>>, vector<1x128xf32>
    %c0_3 = arith.constant 0 : index
    %c0_4 = arith.constant 0 : index
    %2 = vector.load %arg2[%c0_3, %c0_4] : memref<2x128xf32, #tpu.memory_space<vmem>>, vector<2x128xf32>
    %3 = vector.extract_strided_slice %0 {offsets = [0, 0], sizes = [8, 1], strides = [1, 1]} : vector<8x2xf32> to vector<8x1xf32>
    %4 = vector.extract_strided_slice %2 {offsets = [0, 0], sizes = [1, 128], strides = [1, 1]} : vector<2x128xf32> to vector<1x128xf32>
    %5 = vector.broadcast %3 : vector<8x1xf32> to vector<8x128xf32>
    %6 = vector.broadcast %4 : vector<1x128xf32> to vector<8x128xf32>
    %7 = arith.mulf %5, %6 : vector<8x128xf32>
    %8 = vector.broadcast %1 : vector<1x128xf32> to vector<8x128xf32>
    %9 = arith.addf %8, %7 : vector<8x128xf32>
    %10 = vector.extract_strided_slice %0 {offsets = [0, 1], sizes = [8, 1], strides = [1, 1]} : vector<8x2xf32> to vector<8x1xf32>
    %11 = vector.extract_strided_slice %2 {offsets = [1, 0], sizes = [1, 128], strides = [1, 1]} : vector<2x128xf32> to vector<1x128xf32>
    %12 = vector.broadcast %10 : vector<8x1xf32> to vector<8x128xf32>
    %13 = vector.broadcast %11 : vector<1x128xf32> to vector<8x128xf32>
    %14 = arith.mulf %12, %13 : vector<8x128xf32>
    %15 = arith.addf %9, %14 : vector<8x128xf32>
    %cst = arith.constant 0.000000e+00 : f32
    %16 = vector.broadcast %cst : f32 to vector<8x128xf32>
    %17 = arith.maximumf %15, %16 : vector<8x128xf32>
    %c0_5 = arith.constant 0 : index
    %c0_6 = arith.constant 0 : index
    %18 = vector.load %arg5[%c0_5, %c0_6] : memref<1x128xf32, #tpu.memory_space<vmem>>, vector<1x128xf32>
    %c0_7 = arith.constant 0 : index
    %c0_8 = arith.constant 0 : index
    %19 = vector.load %arg4[%c0_7, %c0_8] : memref<128x128xf32, #tpu.memory_space<vmem>>, vector<128x128xf32>
    %cst_9 = arith.constant dense<0.000000e+00> : vector<8x128xf32>
    %20 = tpu.matmul %17, %19, %cst_9 {dimension_numbers = #tpu.dot_dimension_numbers<[1], [0], [0], [1], [0, 0, 1, 1], [], []>} : vector<8x128xf32>, vector<128x128xf32>, vector<8x128xf32> -> vector<8x128xf32>
    %21 = vector.broadcast %18 : vector<1x128xf32> to vector<8x128xf32>
    %22 = arith.addf %20, %21 : vector<8x128xf32>
    %cst_10 = arith.constant 0.000000e+00 : f32
    %23 = vector.broadcast %cst_10 : f32 to vector<8x128xf32>
    %24 = arith.maximumf %22, %23 : vector<8x128xf32>
    %c0_11 = arith.constant 0 : index
    %c0_12 = arith.constant 0 : index
    %25 = vector.load %arg7[%c0_11, %c0_12] : memref<1x128xf32, #tpu.memory_space<vmem>>, vector<1x128xf32>
    %c0_13 = arith.constant 0 : index
    %c0_14 = arith.constant 0 : index
    %26 = vector.load %arg6[%c0_13, %c0_14] : memref<128x128xf32, #tpu.memory_space<vmem>>, vector<128x128xf32>
    %cst_15 = arith.constant dense<0.000000e+00> : vector<8x128xf32>
    %27 = tpu.matmul %24, %26, %cst_15 {dimension_numbers = #tpu.dot_dimension_numbers<[1], [0], [0], [1], [0, 0, 1, 1], [], []>} : vector<8x128xf32>, vector<128x128xf32>, vector<8x128xf32> -> vector<8x128xf32>
    %28 = vector.broadcast %25 : vector<1x128xf32> to vector<8x128xf32>
    %29 = arith.addf %27, %28 : vector<8x128xf32>
    %30 = vector.extract_strided_slice %29 {offsets = [0, 0], sizes = [8, 3], strides = [1, 1]} : vector<8x128xf32> to vector<8x3xf32>
    %c0_16 = arith.constant 0 : index
    %c0_17 = arith.constant 0 : index
    %31 = vector.load %arg8[%c0_16, %c0_17] : memref<8x3xf32, #tpu.memory_space<vmem>>, vector<8x3xf32>
    tpu.vector_store %arg8[%c0_16, %c0_17], %30 {strides = array<i32>} : memref<8x3xf32, #tpu.memory_space<vmem>>, vector<8x3xf32>,
    return
  }
  func.func @transform_0(%arg0: i32) -> (i32, i32) {
    %c0_i32 = arith.constant 0 : i32
    %c0_i32_0 = arith.constant 0 : i32
    return %arg0, %c0_i32 : i32, i32
  }
  func.func @transform_1(%arg0: i32) -> (i32, i32) {
    %c0_i32 = arith.constant 0 : i32
    %c0_i32_0 = arith.constant 0 : i32
    %c0_i32_1 = arith.constant 0 : i32
    return %c0_i32, %c0_i32_0 : i32, i32
  }
  func.func @transform_2(%arg0: i32) -> (i32, i32) {
    %c0_i32 = arith.constant 0 : i32
    %c0_i32_0 = arith.constant 0 : i32
    %c0_i32_1 = arith.constant 0 : i32
    return %c0_i32, %c0_i32_0 : i32, i32
  }
  func.func @transform_3(%arg0: i32) -> (i32, i32) {
    %c0_i32 = arith.constant 0 : i32
    %c0_i32_0 = arith.constant 0 : i32
    %c0_i32_1 = arith.constant 0 : i32
    return %c0_i32, %c0_i32_0 : i32, i32
  }
  func.func @transform_4(%arg0: i32) -> (i32, i32) {
    %c0_i32 = arith.constant 0 : i32
    %c0_i32_0 = arith.constant 0 : i32
    %c0_i32_1 = arith.constant 0 : i32
    return %c0_i32, %c0_i32_0 : i32, i32
  }
  func.func @transform_5(%arg0: i32) -> (i32, i32) {
    %c0_i32 = arith.constant 0 : i32
    %c0_i32_0 = arith.constant 0 : i32
    %c0_i32_1 = arith.constant 0 : i32
    return %c0_i32, %c0_i32_0 : i32, i32
  }
  func.func @transform_6(%arg0: i32) -> (i32, i32) {
    %c0_i32 = arith.constant 0 : i32
    %c0_i32_0 = arith.constant 0 : i32
    %c0_i32_1 = arith.constant 0 : i32
    return %c0_i32, %c0_i32_0 : i32, i32
  }
  func.func @transform_7(%arg0: i32) -> (i32, i32) {
    %c0_i32 = arith.constant 0 : i32
    %c0_i32_0 = arith.constant 0 : i32
    return %arg0, %c0_i32 : i32, i32
  }
}

module attributes {stable_mosaic.version = 11 : i64} {
  func.func @_mlp_kernel(%arg0: i32, %arg1: memref<8x2xf32, #tpu.memory_space<vmem>>, %arg2: memref<2x128xf32, #tpu.memory_space<vmem>>, %arg3: memref<1x128xf32, #tpu.memory_space<vmem>>, %arg4: memref<128x128xf32, #tpu.memory_space<vmem>>, %arg5: memref<1x128xf32, #tpu.memory_space<vmem>>, %arg6: memref<128x128xf32, #tpu.memory_space<vmem>>, %arg7: memref<1x128xf32, #tpu.memory_space<vmem>>, %arg8: memref<8x3xf32, #tpu.memory_space<vmem>>) attributes {dimension_semantics = [#tpu.dimension_semantics<parallel>], iteration_bounds = array<i64: 1>, scalar_prefetch = 0 : i64, scratch_operands = 0 : i64, tpu.core_type = #tpu.core_type<tc>, window_params = [{transform_indices = @transform_0, window_bounds = array<i64: 8, 2>}, {pipeline_mode = #tpu.pipeline_mode<synchronous>, transform_indices = @transform_1, window_bounds = array<i64: 2, 128>}, {pipeline_mode = #tpu.pipeline_mode<synchronous>, transform_indices = @transform_2, window_bounds = array<i64: 1, 128>}, {pipeline_mode = #tpu.pipeline_mode<synchronous>, transform_indices = @transform_3, window_bounds = array<i64: 128, 128>}, {pipeline_mode = #tpu.pipeline_mode<synchronous>, transform_indices = @transform_4, window_bounds = array<i64: 1, 128>}, {pipeline_mode = #tpu.pipeline_mode<synchronous>, transform_indices = @transform_5, window_bounds = array<i64: 128, 128>}, {pipeline_mode = #tpu.pipeline_mode<synchronous>, transform_indices = @transform_6, window_bounds = array<i64: 1, 128>}, {transform_indices = @transform_7, window_bounds = array<i64: 8, 3>}]} {
    %c0 = arith.constant 0 : index
    %c0_0 = arith.constant 0 : index
    %0 = vector.load %arg1[%c0, %c0_0] : memref<8x2xf32, #tpu.memory_space<vmem>>, vector<8x2xf32>
    %c0_1 = arith.constant 0 : index
    %c0_2 = arith.constant 0 : index
    %1 = vector.load %arg3[%c0_1, %c0_2] : memref<1x128xf32, #tpu.memory_space<vmem>>, vector<1x128xf32>
    %c0_3 = arith.constant 0 : index
    %c0_4 = arith.constant 0 : index
    %2 = vector.load %arg2[%c0_3, %c0_4] : memref<2x128xf32, #tpu.memory_space<vmem>>, vector<2x128xf32>
    %3 = vector.extract_strided_slice %0 {offsets = [0, 0], sizes = [8, 1], strides = [1, 1]} : vector<8x2xf32> to vector<8x1xf32>
    %4 = vector.extract_strided_slice %2 {offsets = [0, 0], sizes = [1, 128], strides = [1, 1]} : vector<2x128xf32> to vector<1x128xf32>
    %5 = vector.broadcast %3 : vector<8x1xf32> to vector<8x128xf32>
    %6 = vector.broadcast %4 : vector<1x128xf32> to vector<8x128xf32>
    %7 = arith.mulf %5, %6 : vector<8x128xf32>
    %8 = vector.broadcast %1 : vector<1x128xf32> to vector<8x128xf32>
    %9 = arith.addf %8, %7 : vector<8x128xf32>
    %10 = vector.extract_strided_slice %0 {offsets = [0, 1], sizes = [8, 1], strides = [1, 1]} : vector<8x2xf32> to vector<8x1xf32>
    %11 = vector.extract_strided_slice %2 {offsets = [1, 0], sizes = [1, 128], strides = [1, 1]} : vector<2x128xf32> to vector<1x128xf32>
    %12 = vector.broadcast %10 : vector<8x1xf32> to vector<8x128xf32>
    %13 = vector.broadcast %11 : vector<1x128xf32> to vector<8x128xf32>
    %14 = arith.mulf %12, %13 : vector<8x128xf32>
    %15 = arith.addf %9, %14 : vector<8x128xf32>
    %cst = arith.constant 0.000000e+00 : f32
    %16 = vector.broadcast %cst : f32 to vector<8x128xf32>
    %17 = arith.maximumf %15, %16 : vector<8x128xf32>
    %c0_5 = arith.constant 0 : index
    %c0_6 = arith.constant 0 : index
    %18 = vector.load %arg5[%c0_5, %c0_6] : memref<1x128xf32, #tpu.memory_space<vmem>>, vector<1x128xf32>
    %c0_7 = arith.constant 0 : index
    %c0_8 = arith.constant 0 : index
    %19 = vector.load %arg4[%c0_7, %c0_8] : memref<128x128xf32, #tpu.memory_space<vmem>>, vector<128x128xf32>
    %cst_9 = arith.constant dense<0.000000e+00> : vector<8x128xf32>
    %20 = tpu.matmul %17, %19, %cst_9 {dimension_numbers = #tpu.dot_dimension_numbers<[1], [0], [0], [1], [0, 0, 1, 1], [], []>} : vector<8x128xf32>, vector<128x128xf32>, vector<8x128xf32> -> vector<8x128xf32>
    %21 = vector.broadcast %18 : vector<1x128xf32> to vector<8x128xf32>
    %22 = arith.addf %20, %21 : vector<8x128xf32>
    %cst_10 = arith.constant 0.000000e+00 : f32
    %23 = vector.broadcast %cst_10 : f32 to vector<8x128xf32>
    %24 = arith.maximumf %22, %23 : vector<8x128xf32>
    %c0_11 = arith.constant 0 : index
    %c0_12 = arith.constant 0 : index
    %25 = vector.load %arg7[%c0_11, %c0_12] : memref<1x128xf32, #tpu.memory_space<vmem>>, vector<1x128xf32>
    %c0_13 = arith.constant 0 : index
    %c0_14 = arith.constant 0 : index
    %26 = vector.load %arg6[%c0_13, %c0_14] : memref<128x128xf32, #tpu.memory_space<vmem>>, vector<128x128xf32>
    %cst_15 = arith.constant dense<0.000000e+00> : vector<8x128xf32>
    %27 = tpu.matmul %24, %26, %cst_15 {dimension_numbers = #tpu.dot_dimension_numbers<[1], [0], [0], [1], [0, 0, 1, 1], [], []>} : vector<8x128xf32>, vector<128x128xf32>, vector<8x128xf32> -> vector<8x128xf32>
    %28 = vector.broadcast %25 : vector<1x128xf32> to vector<8x128xf32>
    %29 = arith.addf %27, %28 : vector<8x128xf32>
    %30 = vector.extract_strided_slice %29 {offsets = [0, 0], sizes = [8, 3], strides = [1, 1]} : vector<8x128xf32> to vector<8x3xf32>
    %c0_16 = arith.constant 0 : index
    %c0_17 = arith.constant 0 : index
    %31 = vector.load %arg8[%c0_16, %c0_17] : memref<8x3xf32, #tpu.memory_space<vmem>>, vector<8x3xf32>
    tpu.vector_store %arg8[%c0_16, %c0_17], %30 {strides = array<i32>} : memref<8x3xf32, #tpu.memory_space<vmem>>, vector<8x3xf32>,
    return
  }
  func.func @transform_0(%arg0: i32) -> (i32, i32) {
    %c0_i32 = arith.constant 0 : i32
    %c0_i32_0 = arith.constant 0 : i32
    return %arg0, %c0_i32 : i32, i32
  }
  func.func @transform_1(%arg0: i32) -> (i32, i32) {
    %c0_i32 = arith.constant 0 : i32
    %c0_i32_0 = arith.constant 0 : i32
    %c0_i32_1 = arith.constant 0 : i32
    return %c0_i32, %c0_i32_0 : i32, i32
  }
  func.func @transform_2(%arg0: i32) -> (i32, i32) {
    %c0_i32 = arith.constant 0 : i32
    %c0_i32_0 = arith.constant 0 : i32
    %c0_i32_1 = arith.constant 0 : i32
    return %c0_i32, %c0_i32_0 : i32, i32
  }
  func.func @transform_3(%arg0: i32) -> (i32, i32) {
    %c0_i32 = arith.constant 0 : i32
    %c0_i32_0 = arith.constant 0 : i32
    %c0_i32_1 = arith.constant 0 : i32
    return %c0_i32, %c0_i32_0 : i32, i32
  }
  func.func @transform_4(%arg0: i32) -> (i32, i32) {
    %c0_i32 = arith.constant 0 : i32
    %c0_i32_0 = arith.constant 0 : i32
    %c0_i32_1 = arith.constant 0 : i32
    return %c0_i32, %c0_i32_0 : i32, i32
  }
  func.func @transform_5(%arg0: i32) -> (i32, i32) {
    %c0_i32 = arith.constant 0 : i32
    %c0_i32_0 = arith.constant 0 : i32
    %c0_i32_1 = arith.constant 0 : i32
    return %c0_i32, %c0_i32_0 : i32, i32
  }
  func.func @transform_6(%arg0: i32) -> (i32, i32) {
    %c0_i32 = arith.constant 0 : i32
    %c0_i32_0 = arith.constant 0 : i32
    %c0_i32_1 = arith.constant 0 : i32
    return %c0_i32, %c0_i32_0 : i32, i32
  }
  func.func @transform_7(%arg0: i32) -> (i32, i32) {
    %c0_i32 = arith.constant 0 : i32
    %c0_i32_0 = arith.constant 0 : i32
    return %arg0, %c0_i32 : i32, i32
  }
}

</mosaic_0001>

<bundles_post_ra>
// kernel: tpu_custom_call.1
= control target key start
LH: loop header
LB: loop body
LE: loop exit
PB: predicated region body
PF: predicated region fallthrough
CT: control target
= control target key end

     0   :  { %12 = vsyncpa [#allocation3], 0  ;;  %s547_s0 = inlined_call_operand.vmem [shape: f32[8,2], index: 0, kind: input, shape index: {}]   ;;  %s548_s1 = inlined_call_operand.vmem [shape: f32[2,128], index: 1, kind: input, shape index: {}]   ;;  %s549_s2 = inlined_call_operand.vmem [shape: f32[1,128], index: 2, kind: input, shape index: {}]   ;;  %s550_s3 = inlined_call_operand.hbm [shape: f32[128,128], index: 3, kind: input, shape index: {}]   ;;  %s551_s4 = inlined_call_operand.vmem [shape: f32[1,128], index: 4, kind: input, shape index: {}]   ;;  %s552_s5 = inlined_call_operand.hbm [shape: f32[128,128], index: 5, kind: input, shape index: {}]   ;;  %s553_s6 = inlined_call_operand.vmem [shape: f32[1,128], index: 6, kind: input, shape index: {}]   ;;  %s554_s7 = inlined_call_operand.vmem [shape: f32[8,3], index: 7, kind: output, shape index: {}]  }
   0x1   :  { %13 = vsyncpa [#allocation5], 0  ;;  %s441_s24 = smov [#allocation2]  }
   0x2   :  { %s25_s25 = sshll.u32 %s441_s24, 4  ;;  %s26_s25 = int_to_ptr.vmem [resolvable:$true] %s25_s25 }
   0x3   :  { %s405_s26 = scalar_lea.vmem %s26_s25, 2048  ;;  %p410_p1 = scmp.lt.s32.totalorder %s26_s25, %s26_s25 }
   0x4   :  { %p406_p0 = scmp.ne.s32.totalorder %s26_s25, %s405_s26  ;;  %p411_p2 = scmp.lt.s32.totalorder %s405_s26, %s405_s26 }
   0x6   :  { %p412_p3 = por %p411_p2, %p410_p1 }
   0x8   :  { %p413_p4 = pnand %p412_p3, %p406_p0 }
   0xa   :  { %416 = shalt.err (!%p413_p4)
}
   0xb   :  { %s442_s27 = smov 128   ;;  %s443_s28 = smov 8  }
   0xc   :  { %31 = dma.hbm_to_vmem [thread:$0]  %s550_s3, 2048, %s26_s25, [#allocation3], %s442_s27, %s442_s27, %s443_s28  }
   0xd   :  { %s444_s8 = smov [#allocation4]  }
   0xe   :  { %s39_s9 = sshll.u32 %s444_s8, 4  ;;  %s40_s9 = int_to_ptr.vmem [resolvable:$true] %s39_s9 }
   0xf   :  { %s425_s10 = scalar_lea.vmem %s40_s9, 2048  ;;  %p430_p6 = scmp.lt.s32.totalorder %s40_s9, %s40_s9 }
  0x10   :  { %p426_p5 = scmp.ne.s32.totalorder %s40_s9, %s425_s10  ;;  %p431_p7 = scmp.lt.s32.totalorder %s425_s10, %s425_s10 }
  0x12   :  { %p432_p8 = por %p431_p7, %p430_p6 }
  0x14   :  { %p433_p9 = pnand %p432_p8, %p426_p5 }
  0x16   :  { %436 = shalt.err (!%p433_p9)
}
  0x17   :  { %45 = dma.hbm_to_vmem [thread:$0]  %s552_s5, 2048, %s40_s9, [#allocation5], %s442_s27, %s442_s27, %s443_s28  }
  0x18   :  { %437 = dma.done.wait [#allocation3], 2048  }
  0x19   :  { %438 = vsyncadd [#allocation3], 4294965248 }
  0x1a   :  { %439 = dma.done.wait [#allocation5], 2048  }
  0x1b   :  { %440 = vsyncadd [#allocation5], 4294965248  ;;  %v445_v0 = vmov 0   ;;  %v446_v1 = vmov 0.0   ;;  %v54_v2 = vld [vmem:[%s547_s0] sm:$0xff]  ;;  %v101_v3 = vld [vmem:[#allocation2 + $0x78] sm:$0xff]  ;;  %v62_v33 = vlaneseq }
  0x1c   :  { %395 = vset.pattern.permute.xlu0 %v445_v0  ;;  %317 = vmatprep.subr.mxu0 %v446_v1  ;;  %v100_v4 = vld [vmem:[#allocation2 + $0x70] sm:$0xff]  ;;  %v99_v5 = vld [vmem:[#allocation2 + $0x68] sm:$0xff]  ;;  %v98_v6 = vld [vmem:[#allocation2 + $0x60] sm:$0xff]  ;;  %v447_v7 = vmov 1   ;;  %vm448_vm0 = vmmov 0   ;;  %vm272_vm1 = vcmask 23552  }
  0x1d   :  { %352 = vmatprep.subr.mxu1 %v446_v1  ;;  %59 = vperm.xlu0 %395, %v54_v2   ;;  %v97_v8 = vld [vmem:[#allocation2 + $0x58] sm:$0xff]  ;;  %v96_v9 = vld [vmem:[#allocation2 + $0x50] sm:$0xff]  ;;  %v95_v12 = vld [vmem:[#allocation2 + $0x48] sm:$0xff]  ;;  %v63_v34 = vshrl.u32 %v62_v33, 7 }
  0x1e   :  { %318 = vmatpush3.msra.mxu0 %v101_v3  ;;  %349 = vmatprep.mubr.msk.f32.mxu0 %vm448_vm0, %v446_v1  ;;  %v195_v10 = vld [vmem:[#allocation4 + $0x78] sm:$0xff]  ;;  %v194_v11 = vld [vmem:[#allocation4 + $0x70] sm:$0xff]  ;;  %v193_v13 = vld [vmem:[#allocation4 + $0x68] sm:$0xff] }
  0x1f   :  { %319 = vmatprep.subr.mxu0 %v446_v1  ;;  %384 = vmatprep.mubr.msk.f32.mxu1 %vm448_vm0, %v446_v1  ;;  %v94_v14 = vld [vmem:[#allocation2 + $0x40] sm:$0xff]  ;;  %v93_v16 = vld [vmem:[#allocation2 + $0x38] sm:$0xff]  ;;  %v92_v18 = vld [vmem:[#allocation2 + $0x30] sm:$0xff]  ;;  %v64_v35 = vsub.s32 0, %v63_v34  ;;  %v80_v38 = vsub.s32 1, %v63_v34 }
  0x20   :  { %320 = vmatpush3.msra.mxu0 %v100_v4  ;;  %353 = vmatpush3.msra.mxu1 %v195_v10  ;;  %v192_v15 = vld [vmem:[#allocation4 + $0x60] sm:$0xff]  ;;  %v191_v17 = vld [vmem:[#allocation4 + $0x58] sm:$0xff]  ;;  %v190_v19 = vld [vmem:[#allocation4 + $0x50] sm:$0xff] }
  0x21   :  { %321 = vmatprep.subr.mxu0 %v446_v1  ;;  %396 = vset.pattern.permute.xlu0 %v447_v7  ;;  %v91_v20 = vld [vmem:[#allocation2 + $0x28] sm:$0xff]  ;;  %v90_v22 = vld [vmem:[#allocation2 + $0x20] sm:$0xff]  ;;  %v89_v24 = vld [vmem:[#allocation2 + $0x18] sm:$0xff] }
  0x22   :  { %322 = vmatpush3.msra.mxu0 %v99_v5  ;;  %75 = vperm.xlu0 %396, %v54_v2   ;;  %v189_v21 = vld [vmem:[#allocation4 + $0x48] sm:$0xff]  ;;  %v188_v23 = vld [vmem:[#allocation4 + $0x40] sm:$0xff]  ;;  %v187_v25 = vld [vmem:[#allocation4 + $0x38] sm:$0xff] }
  0x23   :  { %323 = vmatprep.subr.mxu0 %v446_v1  ;;  %354 = vmatprep.subr.mxu1 %v446_v1  ;;  %v88_v26 = vld [vmem:[#allocation2 + $0x10] sm:$0xff]  ;;  %v87_v28 = vld [vmem:[#allocation2 + $0x8] sm:$0xff]  ;;  %v86_v30 = vld [vmem:[#allocation2] sm:$0xff] }
  0x24   :  { %324 = vmatpush3.msra.mxu0 %v98_v6  ;;  %355 = vmatpush3.msra.mxu1 %v194_v11  ;;  %v186_v27 = vld [vmem:[#allocation4 + $0x30] sm:$0xff]  ;;  %v185_v29 = vld [vmem:[#allocation4 + $0x28] sm:$0xff]  ;;  %v184_v31 = vld [vmem:[#allocation4 + $0x20] sm:$0xff] }
  0x25   :  { %325 = vmatprep.subr.mxu0 %v446_v1  ;;  %356 = vmatprep.subr.mxu1 %v446_v1  ;;  %v183_v32 = vld [vmem:[#allocation4 + $0x18] sm:$0xff]  ;;  %v56_v36 = vld [vmem:[%s548_s1] sm:$0x3]  ;;  %v182_v48 = vld [vmem:[#allocation4 + $0x10] sm:$0xff] }
  0x26   :  { %326 = vmatpush3.msra.mxu0 %v97_v8  ;;  %357 = vmatpush3.msra.mxu1 %v193_v13  ;;  %v65_v37 = vrot.slane %v56_v36, %v64_v35  ;;  %v81_v41 = vrot.slane %v56_v36, %v80_v38  ;;  %v280_v42 = vld [vmem:[%s549_s2] ss:$0 sm:$0xff]  ;;  %v181_v49 = vld [vmem:[#allocation4 + $0x8] sm:$0xff] }
  0x27   :  { %327 = vmatprep.subr.mxu0 %v446_v1  ;;  %358 = vmatprep.subr.mxu1 %v446_v1  ;;  %v180_v50 = vld [vmem:[#allocation4] sm:$0xff] }
  0x28   :  { %328 = vmatpush3.msra.mxu0 %v96_v9  ;;  %359 = vmatpush3.msra.mxu1 %v192_v15  ;;  %v281_v51 = vld [vmem:[%s551_s4] ss:$0 sm:$0xff] }
  0x29   :  { %329 = vmatprep.subr.mxu0 %v446_v1  ;;  %360 = vmatprep.subr.mxu1 %v446_v1  ;;  %v282_v56 = vld [vmem:[%s553_s6] ss:$0 sm:$0xff] }
  0x2a   :  { %330 = vmatpush3.msra.mxu0 %v95_v12  ;;  %361 = vmatpush3.msra.mxu1 %v191_v17 }
  0x2b   :  { %331 = vmatprep.subr.mxu0 %v446_v1  ;;  %362 = vmatprep.subr.mxu1 %v446_v1 }
  0x2c   :  { %332 = vmatpush3.msra.mxu0 %v94_v14  ;;  %363 = vmatpush3.msra.mxu1 %v190_v19 }
  0x2d   :  { %333 = vmatprep.subr.mxu0 %v446_v1  ;;  %364 = vmatprep.subr.mxu1 %v446_v1 }
  0x2e   :  { %334 = vmatpush3.msra.mxu0 %v93_v16  ;;  %365 = vmatpush3.msra.mxu1 %v189_v21 }
  0x2f   :  { %335 = vmatprep.subr.mxu0 %v446_v1  ;;  %366 = vmatprep.subr.mxu1 %v446_v1 }
  0x30   :  { %336 = vmatpush3.msra.mxu0 %v92_v18  ;;  %367 = vmatpush3.msra.mxu1 %v188_v23 }
  0x31   :  { %337 = vmatprep.subr.mxu0 %v446_v1  ;;  %368 = vmatprep.subr.mxu1 %v446_v1 }
  0x32   :  { %338 = vmatpush3.msra.mxu0 %v91_v20  ;;  %369 = vmatpush3.msra.mxu1 %v187_v25 }
  0x33   :  { %339 = vmatprep.subr.mxu0 %v446_v1  ;;  %370 = vmatprep.subr.mxu1 %v446_v1 }
  0x34   :  { %340 = vmatpush3.msra.mxu0 %v90_v22  ;;  %371 = vmatpush3.msra.mxu1 %v186_v27 }
  0x35   :  { %341 = vmatprep.subr.mxu0 %v446_v1  ;;  %372 = vmatprep.subr.mxu1 %v446_v1 }
  0x36   :  { %342 = vmatpush3.msra.mxu0 %v89_v24  ;;  %373 = vmatpush3.msra.mxu1 %v185_v29 }
  0x37   :  { %343 = vmatprep.subr.mxu0 %v446_v1  ;;  %374 = vmatprep.subr.mxu1 %v446_v1 }
  0x38   :  { %344 = vmatpush3.msra.mxu0 %v88_v26  ;;  %375 = vmatpush3.msra.mxu1 %v184_v31 }
  0x39   :  { %345 = vmatprep.subr.mxu0 %v446_v1  ;;  %376 = vmatprep.subr.mxu1 %v446_v1 }
  0x3a   :  { %346 = vmatpush3.msra.mxu0 %v87_v28  ;;  %377 = vmatpush3.msra.mxu1 %v183_v32 }
  0x3b   :  { %347 = vmatprep.subr.mxu0 %v446_v1  ;;  %378 = vmatprep.subr.mxu1 %v446_v1 }
  0x3c   :  { %348 = vmatpush3.msra.mxu0 %v86_v30  ;;  %379 = vmatpush3.msra.mxu1 %v182_v48 }
  0x3d   :  { %380 = vmatprep.subr.mxu1 %v446_v1 }
  0x3e   :  { %381 = vmatpush3.msra.mxu1 %v181_v49 }
  0x3f   :  { %382 = vmatprep.subr.mxu1 %v446_v1 }
  0x40   :  { %383 = vmatpush3.msra.mxu1 %v180_v50 }
  0x98   :  { %v60_v39 = vpop.permute.xlu0 %59 }
  0x99   :  { %v66_v40 = vmul.f32 %v65_v37, %v60_v39 }
  0x9b   :  { %v73_v44 = vadd.f32 %v280_v42, %v66_v40 }
  0x9d   :  { %v76_v43 = vpop.permute.xlu0 %75 }
  0x9e   :  { %v82_v45 = vmul.f32 %v81_v41, %v76_v43 }
  0xa0   :  { %v83_v46 = vadd.f32 %v82_v45, %v73_v44 }
  0xa2   :  { %v84_v47 = vmax.f32 %v83_v46, 0.0 }
  0xa4   :  { %350 = vmatmul.mubr.f32.vlgmr.msra.gmra.mxu0 %v84_v47 }
 0x164   :  { %v174_v52 = vpop.f32.mrf.mxu0 }
 0x165   :  { %v175_v53 = vadd.f32 %v281_v51, %v174_v52 }
 0x166   :  { %v351_v54 = vpop.f32.mrf.mxu0 }
 0x167   :  { %v178_v55 = vmax.f32 %v175_v53, 0.0 }
 0x169   :  { %385 = vmatmul.mubr.f32.vlgmr.msra.gmra.mxu1 %v178_v55 }
 0x229   :  { %v268_v57 = vpop.f32.mrf.mxu1 }
 0x22a   :  { %v269_v58 = vadd.f32 %v282_v56, %v268_v57 }
 0x22b   :  { %v386_v59 = vpop.f32.mrf.mxu1 }
 0x22c   :  { %273 = vst.msk [vmem:[%s554_s7] sm:$0xff] %vm272_vm1, %v269_v58 }
 0x22d   :  { %278 = vsyncpa [#allocation3], 1 }
 0x22e   :  { %279 = vsyncpa [#allocation5], 1 }

// kernel: tpu_custom_call.1
= control target key start
LH: loop header
LB: loop body
LE: loop exit
PB: predicated region body
PF: predicated region fallthrough
CT: control target
= control target key end

     0   :  { %12 = vsyncpa [#allocation3], 0  ;;  %s547_s0 = inlined_call_operand.vmem [shape: f32[8,2], index: 0, kind: input, shape index: {}]   ;;  %s548_s1 = inlined_call_operand.vmem [shape: f32[2,128], index: 1, kind: input, shape index: {}]   ;;  %s549_s2 = inlined_call_operand.vmem [shape: f32[1,128], index: 2, kind: input, shape index: {}]   ;;  %s550_s3 = inlined_call_operand.hbm [shape: f32[128,128], index: 3, kind: input, shape index: {}]   ;;  %s551_s4 = inlined_call_operand.vmem [shape: f32[1,128], index: 4, kind: input, shape index: {}]   ;;  %s552_s5 = inlined_call_operand.hbm [shape: f32[128,128], index: 5, kind: input, shape index: {}]   ;;  %s553_s6 = inlined_call_operand.vmem [shape: f32[1,128], index: 6, kind: input, shape index: {}]   ;;  %s554_s7 = inlined_call_operand.vmem [shape: f32[8,3], index: 7, kind: output, shape index: {}]  }
   0x1   :  { %13 = vsyncpa [#allocation5], 0  ;;  %s441_s24 = smov [#allocation2]  }
   0x2   :  { %s25_s25 = sshll.u32 %s441_s24, 4  ;;  %s26_s25 = int_to_ptr.vmem [resolvable:$true] %s25_s25 }
   0x3   :  { %s405_s26 = scalar_lea.vmem %s26_s25, 2048  ;;  %p410_p1 = scmp.lt.s32.totalorder %s26_s25, %s26_s25 }
   0x4   :  { %p406_p0 = scmp.ne.s32.totalorder %s26_s25, %s405_s26  ;;  %p411_p2 = scmp.lt.s32.totalorder %s405_s26, %s405_s26 }
   0x6   :  { %p412_p3 = por %p411_p2, %p410_p1 }
   0x8   :  { %p413_p4 = pnand %p412_p3, %p406_p0 }
   0xa   :  { %416 = shalt.err (!%p413_p4)
}
   0xb   :  { %s442_s27 = smov 128   ;;  %s443_s28 = smov 8  }
   0xc   :  { %31 = dma.hbm_to_vmem [thread:$0]  %s550_s3, 2048, %s26_s25, [#allocation3], %s442_s27, %s442_s27, %s443_s28  }
   0xd   :  { %s444_s8 = smov [#allocation4]  }
   0xe   :  { %s39_s9 = sshll.u32 %s444_s8, 4  ;;  %s40_s9 = int_to_ptr.vmem [resolvable:$true] %s39_s9 }
   0xf   :  { %s425_s10 = scalar_lea.vmem %s40_s9, 2048  ;;  %p430_p6 = scmp.lt.s32.totalorder %s40_s9, %s40_s9 }
  0x10   :  { %p426_p5 = scmp.ne.s32.totalorder %s40_s9, %s425_s10  ;;  %p431_p7 = scmp.lt.s32.totalorder %s425_s10, %s425_s10 }
  0x12   :  { %p432_p8 = por %p431_p7, %p430_p6 }
  0x14   :  { %p433_p9 = pnand %p432_p8, %p426_p5 }
  0x16   :  { %436 = shalt.err (!%p433_p9)
}
  0x17   :  { %45 = dma.hbm_to_vmem [thread:$0]  %s552_s5, 2048, %s40_s9, [#allocation5], %s442_s27, %s442_s27, %s443_s28  }
  0x18   :  { %437 = dma.done.wait [#allocation3], 2048  }
  0x19   :  { %438 = vsyncadd [#allocation3], 4294965248 }
  0x1a   :  { %439 = dma.done.wait [#allocation5], 2048  }
  0x1b   :  { %440 = vsyncadd [#allocation5], 4294965248  ;;  %v445_v0 = vmov 0   ;;  %v446_v1 = vmov 0.0   ;;  %v54_v2 = vld [vmem:[%s547_s0] sm:$0xff]  ;;  %v101_v3 = vld [vmem:[#allocation2 + $0x78] sm:$0xff]  ;;  %v62_v33 = vlaneseq }
  0x1c   :  { %395 = vset.pattern.permute.xlu0 %v445_v0  ;;  %317 = vmatprep.subr.mxu0 %v446_v1  ;;  %v100_v4 = vld [vmem:[#allocation2 + $0x70] sm:$0xff]  ;;  %v99_v5 = vld [vmem:[#allocation2 + $0x68] sm:$0xff]  ;;  %v98_v6 = vld [vmem:[#allocation2 + $0x60] sm:$0xff]  ;;  %v447_v7 = vmov 1   ;;  %vm448_vm0 = vmmov 0   ;;  %vm272_vm1 = vcmask 23552  }
  0x1d   :  { %352 = vmatprep.subr.mxu1 %v446_v1  ;;  %59 = vperm.xlu0 %395, %v54_v2   ;;  %v97_v8 = vld [vmem:[#allocation2 + $0x58] sm:$0xff]  ;;  %v96_v9 = vld [vmem:[#allocation2 + $0x50] sm:$0xff]  ;;  %v95_v12 = vld [vmem:[#allocation2 + $0x48] sm:$0xff]  ;;  %v63_v34 = vshrl.u32 %v62_v33, 7 }
  0x1e   :  { %318 = vmatpush3.msra.mxu0 %v101_v3  ;;  %349 = vmatprep.mubr.msk.f32.mxu0 %vm448_vm0, %v446_v1  ;;  %v195_v10 = vld [vmem:[#allocation4 + $0x78] sm:$0xff]  ;;  %v194_v11 = vld [vmem:[#allocation4 + $0x70] sm:$0xff]  ;;  %v193_v13 = vld [vmem:[#allocation4 + $0x68] sm:$0xff] }
  0x1f   :  { %319 = vmatprep.subr.mxu0 %v446_v1  ;;  %384 = vmatprep.mubr.msk.f32.mxu1 %vm448_vm0, %v446_v1  ;;  %v94_v14 = vld [vmem:[#allocation2 + $0x40] sm:$0xff]  ;;  %v93_v16 = vld [vmem:[#allocation2 + $0x38] sm:$0xff]  ;;  %v92_v18 = vld [vmem:[#allocation2 + $0x30] sm:$0xff]  ;;  %v64_v35 = vsub.s32 0, %v63_v34  ;;  %v80_v38 = vsub.s32 1, %v63_v34 }
  0x20   :  { %320 = vmatpush3.msra.mxu0 %v100_v4  ;;  %353 = vmatpush3.msra.mxu1 %v195_v10  ;;  %v192_v15 = vld [vmem:[#allocation4 + $0x60] sm:$0xff]  ;;  %v191_v17 = vld [vmem:[#allocation4 + $0x58] sm:$0xff]  ;;  %v190_v19 = vld [vmem:[#allocation4 + $0x50] sm:$0xff] }
  0x21   :  { %321 = vmatprep.subr.mxu0 %v446_v1  ;;  %396 = vset.pattern.permute.xlu0 %v447_v7  ;;  %v91_v20 = vld [vmem:[#allocation2 + $0x28] sm:$0xff]  ;;  %v90_v22 = vld [vmem:[#allocation2 + $0x20] sm:$0xff]  ;;  %v89_v24 = vld [vmem:[#allocation2 + $0x18] sm:$0xff] }
  0x22   :  { %322 = vmatpush3.msra.mxu0 %v99_v5  ;;  %75 = vperm.xlu0 %396, %v54_v2   ;;  %v189_v21 = vld [vmem:[#allocation4 + $0x48] sm:$0xff]  ;;  %v188_v23 = vld [vmem:[#allocation4 + $0x40] sm:$0xff]  ;;  %v187_v25 = vld [vmem:[#allocation4 + $0x38] sm:$0xff] }
  0x23   :  { %323 = vmatprep.subr.mxu0 %v446_v1  ;;  %354 = vmatprep.subr.mxu1 %v446_v1  ;;  %v88_v26 = vld [vmem:[#allocation2 + $0x10] sm:$0xff]  ;;  %v87_v28 = vld [vmem:[#allocation2 + $0x8] sm:$0xff]  ;;  %v86_v30 = vld [vmem:[#allocation2] sm:$0xff] }
  0x24   :  { %324 = vmatpush3.msra.mxu0 %v98_v6  ;;  %355 = vmatpush3.msra.mxu1 %v194_v11  ;;  %v186_v27 = vld [vmem:[#allocation4 + $0x30] sm:$0xff]  ;;  %v185_v29 = vld [vmem:[#allocation4 + $0x28] sm:$0xff]  ;;  %v184_v31 = vld [vmem:[#allocation4 + $0x20] sm:$0xff] }
  0x25   :  { %325 = vmatprep.subr.mxu0 %v446_v1  ;;  %356 = vmatprep.subr.mxu1 %v446_v1  ;;  %v183_v32 = vld [vmem:[#allocation4 + $0x18] sm:$0xff]  ;;  %v56_v36 = vld [vmem:[%s548_s1] sm:$0x3]  ;;  %v182_v48 = vld [vmem:[#allocation4 + $0x10] sm:$0xff] }
  0x26   :  { %326 = vmatpush3.msra.mxu0 %v97_v8  ;;  %357 = vmatpush3.msra.mxu1 %v193_v13  ;;  %v65_v37 = vrot.slane %v56_v36, %v64_v35  ;;  %v81_v41 = vrot.slane %v56_v36, %v80_v38  ;;  %v280_v42 = vld [vmem:[%s549_s2] ss:$0 sm:$0xff]  ;;  %v181_v49 = vld [vmem:[#allocation4 + $0x8] sm:$0xff] }
  0x27   :  { %327 = vmatprep.subr.mxu0 %v446_v1  ;;  %358 = vmatprep.subr.mxu1 %v446_v1  ;;  %v180_v50 = vld [vmem:[#allocation4] sm:$0xff] }
  0x28   :  { %328 = vmatpush3.msra.mxu0 %v96_v9  ;;  %359 = vmatpush3.msra.mxu1 %v192_v15  ;;  %v281_v51 = vld [vmem:[%s551_s4] ss:$0 sm:$0xff] }
  0x29   :  { %329 = vmatprep.subr.mxu0 %v446_v1  ;;  %360 = vmatprep.subr.mxu1 %v446_v1  ;;  %v282_v56 = vld [vmem:[%s553_s6] ss:$0 sm:$0xff] }
  0x2a   :  { %330 = vmatpush3.msra.mxu0 %v95_v12  ;;  %361 = vmatpush3.msra.mxu1 %v191_v17 }
  0x2b   :  { %331 = vmatprep.subr.mxu0 %v446_v1  ;;  %362 = vmatprep.subr.mxu1 %v446_v1 }
  0x2c   :  { %332 = vmatpush3.msra.mxu0 %v94_v14  ;;  %363 = vmatpush3.msra.mxu1 %v190_v19 }
  0x2d   :  { %333 = vmatprep.subr.mxu0 %v446_v1  ;;  %364 = vmatprep.subr.mxu1 %v446_v1 }
  0x2e   :  { %334 = vmatpush3.msra.mxu0 %v93_v16  ;;  %365 = vmatpush3.msra.mxu1 %v189_v21 }
  0x2f   :  { %335 = vmatprep.subr.mxu0 %v446_v1  ;;  %366 = vmatprep.subr.mxu1 %v446_v1 }
  0x30   :  { %336 = vmatpush3.msra.mxu0 %v92_v18  ;;  %367 = vmatpush3.msra.mxu1 %v188_v23 }
  0x31   :  { %337 = vmatprep.subr.mxu0 %v446_v1  ;;  %368 = vmatprep.subr.mxu1 %v446_v1 }
  0x32   :  { %338 = vmatpush3.msra.mxu0 %v91_v20  ;;  %369 = vmatpush3.msra.mxu1 %v187_v25 }
  0x33   :  { %339 = vmatprep.subr.mxu0 %v446_v1  ;;  %370 = vmatprep.subr.mxu1 %v446_v1 }
  0x34   :  { %340 = vmatpush3.msra.mxu0 %v90_v22  ;;  %371 = vmatpush3.msra.mxu1 %v186_v27 }
  0x35   :  { %341 = vmatprep.subr.mxu0 %v446_v1  ;;  %372 = vmatprep.subr.mxu1 %v446_v1 }
  0x36   :  { %342 = vmatpush3.msra.mxu0 %v89_v24  ;;  %373 = vmatpush3.msra.mxu1 %v185_v29 }
  0x37   :  { %343 = vmatprep.subr.mxu0 %v446_v1  ;;  %374 = vmatprep.subr.mxu1 %v446_v1 }
  0x38   :  { %344 = vmatpush3.msra.mxu0 %v88_v26  ;;  %375 = vmatpush3.msra.mxu1 %v184_v31 }
  0x39   :  { %345 = vmatprep.subr.mxu0 %v446_v1  ;;  %376 = vmatprep.subr.mxu1 %v446_v1 }
  0x3a   :  { %346 = vmatpush3.msra.mxu0 %v87_v28  ;;  %377 = vmatpush3.msra.mxu1 %v183_v32 }
  0x3b   :  { %347 = vmatprep.subr.mxu0 %v446_v1  ;;  %378 = vmatprep.subr.mxu1 %v446_v1 }
  0x3c   :  { %348 = vmatpush3.msra.mxu0 %v86_v30  ;;  %379 = vmatpush3.msra.mxu1 %v182_v48 }
  0x3d   :  { %380 = vmatprep.subr.mxu1 %v446_v1 }
  0x3e   :  { %381 = vmatpush3.msra.mxu1 %v181_v49 }
  0x3f   :  { %382 = vmatprep.subr.mxu1 %v446_v1 }
  0x40   :  { %383 = vmatpush3.msra.mxu1 %v180_v50 }
  0x98   :  { %v60_v39 = vpop.permute.xlu0 %59 }
  0x99   :  { %v66_v40 = vmul.f32 %v65_v37, %v60_v39 }
  0x9b   :  { %v73_v44 = vadd.f32 %v280_v42, %v66_v40 }
  0x9d   :  { %v76_v43 = vpop.permute.xlu0 %75 }
  0x9e   :  { %v82_v45 = vmul.f32 %v81_v41, %v76_v43 }
  0xa0   :  { %v83_v46 = vadd.f32 %v82_v45, %v73_v44 }
  0xa2   :  { %v84_v47 = vmax.f32 %v83_v46, 0.0 }
  0xa4   :  { %350 = vmatmul.mubr.f32.vlgmr.msra.gmra.mxu0 %v84_v47 }
 0x164   :  { %v174_v52 = vpop.f32.mrf.mxu0 }
 0x165   :  { %v175_v53 = vadd.f32 %v281_v51, %v174_v52 }
 0x166   :  { %v351_v54 = vpop.f32.mrf.mxu0 }
 0x167   :  { %v178_v55 = vmax.f32 %v175_v53, 0.0 }
 0x169   :  { %385 = vmatmul.mubr.f32.vlgmr.msra.gmra.mxu1 %v178_v55 }
 0x229   :  { %v268_v57 = vpop.f32.mrf.mxu1 }
 0x22a   :  { %v269_v58 = vadd.f32 %v282_v56, %v268_v57 }
 0x22b   :  { %v386_v59 = vpop.f32.mrf.mxu1 }
 0x22c   :  { %273 = vst.msk [vmem:[%s554_s7] sm:$0xff] %vm272_vm1, %v269_v58 }
 0x22d   :  { %278 = vsyncpa [#allocation3], 1 }
 0x22e   :  { %279 = vsyncpa [#allocation5], 1 }

</bundles_post_ra>
